<compile_context>
chip_gen: v7x
topology: tpu7x:2x2x1
jax: 0.10.0
libtpu: 0.0.40
codegen_flags: <defaults>
</compile_context>

<pallas_src>
import functools
import math

import jax
import jax.numpy as jnp
from jax.experimental import pallas as pl
from jax.experimental.pallas import tpu as pltpu


H1, H2 = 300, 200            # true hidden widths (LayerNorm N)
H1_PAD, H2_PAD = 384, 256    # lane-dense padded widths (multiples of 128)


def _round_up(x, m):
    return ((x + m - 1) // m) * m


def _device_kind():
    try:
        return jax.devices()[0].device_kind.lower()
    except Exception:  # pragma: no cover - non-TPU fallback
        return ""


def default_dtypes():
    """(weight/matmul-operand dtype, elementwise-tail dtype) for this chip."""
    kind = _device_kind()
    weight_dtype = jnp.bfloat16                      # default everywhere now
    # bf16 VALU exists on v6e/v7x only; keep the elementwise tail f32 on v5-.
    ew_dtype = jnp.bfloat16 if ("v6" in kind or "v7" in kind) else jnp.float32
    return weight_dtype, ew_dtype


# ----------------------------------------------------------------------------
# Parameter init (deterministic, mirrors nn.init.orthogonal_ + constant bias)
# ----------------------------------------------------------------------------
def orthogonal_init(key, shape, gain):
    """Orthogonal init for a 2-D weight of `shape` (rows, cols), like PyTorch."""
    rows, cols = shape
    a = jax.random.normal(key, (rows, cols), dtype=jnp.float32)
    transpose = rows < cols
    if transpose:
        a = a.T
    q, r = jnp.linalg.qr(a)
    diag = jnp.diagonal(r)
    d = jnp.where(diag == 0, 1.0, jnp.sign(diag))
    q = q * d[None, :]
    if transpose:
        q = q.T
    return gain * q.astype(jnp.float32)


def make_actor_params(key, ob_dim, ac_dim):
    """Unpadded, reference-layout params (weights [in, out], vectors [1, N])."""
    k1, k2, k3, k4, k5 = jax.random.split(key, 5)
    w1 = orthogonal_init(k1, (H1, ob_dim), math.sqrt(2)).T         # [ob_dim, 300]
    b1 = jnp.zeros((1, H1), jnp.float32)
    g1 = jnp.ones((1, H1), jnp.float32)                            # LN weight
    be1 = jnp.zeros((1, H1), jnp.float32)                          # LN bias

    w2 = orthogonal_init(k2, (H2, H1), math.sqrt(2)).T             # [300, 200]
    b2 = jnp.zeros((1, H2), jnp.float32)
    g2 = jnp.ones((1, H2), jnp.float32)
    be2 = jnp.zeros((1, H2), jnp.float32)

    w3 = orthogonal_init(k3, (ac_dim, H2), 0.01).T                 # [200, ac_dim]
    b3 = jnp.zeros((1, ac_dim), jnp.float32)

    # rms_obs running statistics (synthetic but deterministic)
    rms_mean = 0.1 * jax.random.normal(k4, (1, ob_dim), dtype=jnp.float32)
    rms_std = 1.0 + 0.05 * jnp.abs(jax.random.normal(k5, (1, ob_dim),
                                                     dtype=jnp.float32))
    return dict(w1=w1, b1=b1, g1=g1, be1=be1,
                w2=w2, b2=b2, g2=g2, be2=be2,
                w3=w3, b3=b3, rms_mean=rms_mean, rms_std=rms_std)


def _pad_to(a, rows, cols):
    return jnp.pad(a, ((0, rows - a.shape[0]), (0, cols - a.shape[1])))


def pack_actor_params(p, ob_dim, ac_dim, weight_dtype=jnp.bfloat16):
    """Kernel-layout params: padded, lane-dense, small vectors packed.

    Padding of bias / gamma / beta is ZERO (load-bearing): padded lanes stay
    exactly 0 through Linear -> LayerNorm -> ReLU, so LN sums over the padded
    width divided by the true N are correct and the next matmul is unaffected.
    """
    ac_pad = _round_up(max(ac_dim, 1), 128)

    inv_std = 1.0 / p["rms_std"]                         # (1, ob_dim)
    shift = -p["rms_mean"] * inv_std                     # (1, ob_dim)
    normp = jnp.concatenate([inv_std, shift], axis=0)    # (2, ob_dim)

    w1 = _pad_to(p["w1"], ob_dim, H1_PAD).astype(weight_dtype)        # (ob_dim, 384)
    l1 = _pad_to(jnp.concatenate([p["b1"], p["g1"], p["be1"]], 0), 3, H1_PAD)

    w2 = _pad_to(p["w2"], H1_PAD, H2_PAD).astype(weight_dtype)        # (384, 256)
    l2 = _pad_to(jnp.concatenate([p["b2"], p["g2"], p["be2"]], 0), 3, H2_PAD)

    w3 = _pad_to(p["w3"], H2_PAD, ac_pad).astype(weight_dtype)        # (256, ac_pad)
    b3 = _pad_to(p["b3"], 1, ac_pad)

    return dict(normp=normp, w1=w1, l1=l1, w2=w2, l2=l2, w3=w3, b3=b3)


# ----------------------------------------------------------------------------
# Pallas kernel: fused forward for one batch tile; all params VMEM-resident.
# ----------------------------------------------------------------------------
def _ln_relu(h, gamma, beta, inv_n, ew_dtype, eps=1e-5):
    """LayerNorm (stats over the true N) + ReLU.

    Statistics (sums, mean, var, rsqrt) are computed in f32; the affine
    (*gamma + beta), the ReLU and the result dtype use `ew_dtype` (bf16 on
    v6e/v7x -> packed VALU ops and no separate pre-dot cast).
    Single-pass variance (E[x^2]-E[x]^2) with a max(.,0) guard; fine in f32
    at these activation scales (see review note).
    """
    s1 = jnp.sum(h, axis=-1, keepdims=True)
    s2 = jnp.sum(h * h, axis=-1, keepdims=True)
    mu = s1 * inv_n
    var = jnp.maximum(s2 * inv_n - mu * mu, 0.0)
    r = jax.lax.rsqrt(var + eps)
    t = ((h - mu) * r).astype(ew_dtype)
    t = t * gamma.astype(ew_dtype) + beta.astype(ew_dtype)
    return jnp.maximum(t, 0.0)


def actor_kernel(normp_ref, w1_ref, l1_ref, w2_ref, l2_ref, w3_ref, b3_ref,
                 ob_ref, out_ref, *, ac_max, inv_n1, inv_n2, ew_dtype):
    cdt = w1_ref.dtype   # matmul-operand dtype (bf16 default); accumulation f32

    norm = normp_ref[...]
    # rms_obs.standardize(ob).clamp(-5, 5) as one FMA + clip (f32, tiny width)
    x = jnp.clip(ob_ref[...] * norm[0:1, :] + norm[1:2, :], -5.0, 5.0)

    # fc_stack: Linear(ob_dim, 300) -> LayerNorm(300) -> ReLU
    l1 = l1_ref[...]
    h = jnp.dot(x.astype(cdt), w1_ref[...],
                preferred_element_type=jnp.float32) + l1[0:1, :]
    h = _ln_relu(h, l1[1:2, :], l1[2:3, :], inv_n1, ew_dtype)

    # a_fc_stack: Linear(300, 200) -> LayerNorm(200) -> ReLU
    l2 = l2_ref[...]
    h = jnp.dot(h.astype(cdt), w2_ref[...],
                preferred_element_type=jnp.float32) + l2[0:1, :]
    h = _ln_relu(h, l2[1:2, :], l2[2:3, :], inv_n2, ew_dtype)

    # a_head: Linear(200, ac_dim), then ac_max * tanh
    a = jnp.dot(h.astype(cdt), w3_ref[...],
                preferred_element_type=jnp.float32) + b3_ref[...]
    out_ref[...] = (ac_max * jnp.tanh(a)).astype(out_ref.dtype)


def actor_forward(ob, packed, ac_max, ac_dim, tile_b=1024, ew_dtype=None,
                  out_dtype=jnp.float32, return_padded=False):
    """ob: [B, ob_dim] f32 -> action [B, ac_dim] (out_dtype).

    `return_padded=True` returns the (B_pad, 128-lane) kernel output without
    the post-kernel slice (cheaper on v5e for very large batches; slice at the
    consumer instead).
    """
    B, ob_dim = ob.shape
    ac_pad = packed["w3"].shape[1]
    assert packed["w1"].shape[0] == ob_dim

    if ew_dtype is None:
        _, ew_dtype = default_dtypes()

    kind = _device_kind()
    core_parallel = "v7" in kind   # 2 TensorCores / chip

    # Batch tile: multiple of 8 (f32 sublane), capped by the requested size.
    tb = min(_round_up(tile_b, 8), _round_up(max(B, 1), 8))
    if core_parallel and B > 8:
        # Both TCs must get work: at least 2 tiles, roughly even count.
        tb = min(tb, _round_up(pl.cdiv(B, 2), 8))
        n_tiles = pl.cdiv(B, tb)
        if n_tiles % 2 == 1 and n_tiles > 1:
            tb = _round_up(pl.cdiv(B, n_tiles + 1), 8)
    n_tiles = pl.cdiv(B, tb)
    b_pad = n_tiles * tb
    if b_pad != B:
        ob = jnp.pad(ob, ((0, b_pad - B), (0, 0)))

    def resident(shape):
        # Same block index every grid step -> fetched once, stays in VMEM.
        return pl.BlockSpec(shape, lambda i: (0, 0))

    in_specs = [
        resident(packed["normp"].shape),
        resident(packed["w1"].shape),
        resident(packed["l1"].shape),
        resident(packed["w2"].shape),
        resident(packed["l2"].shape),
        resident(packed["w3"].shape),
        resident(packed["b3"].shape),
        pl.BlockSpec((tb, ob_dim), lambda i: (i, 0)),      # activations stream
    ]
    out_specs = pl.BlockSpec((tb, ac_pad), lambda i: (i, 0))

    semantics = (pltpu.CORE_PARALLEL,) if core_parallel else ("parallel",)

    out = pl.pallas_call(
        functools.partial(actor_kernel, ac_max=float(ac_max),
                          inv_n1=1.0 / H1, inv_n2=1.0 / H2, ew_dtype=ew_dtype),
        out_shape=jax.ShapeDtypeStruct((b_pad, ac_pad), out_dtype),
        grid=(n_tiles,),
        in_specs=in_specs,
        out_specs=out_specs,
        compiler_params=pltpu.CompilerParams(
            dimension_semantics=semantics,
            vmem_limit_bytes=48 * 1024 * 1024),
    )(packed["normp"], packed["w1"], packed["l1"], packed["w2"],
      packed["l2"], packed["w3"], packed["b3"], ob)

    if return_padded:
        return out
    return out[:B, :ac_dim]


# ----------------------------------------------------------------------------
# Pure-JAX reference (original, un-optimized math: divide + two-pass LN)
# ----------------------------------------------------------------------------
def _layernorm_ref(h, gamma, beta, eps=1e-5):
    mu = jnp.mean(h, axis=-1, keepdims=True)
    var = jnp.mean((h - mu) * (h - mu), axis=-1, keepdims=True)
    return (h - mu) / jnp.sqrt(var + eps) * gamma + beta


def actor_forward_ref(ob, p, ac_max):
    x = jnp.clip((ob - p["rms_mean"]) / p["rms_std"], -5.0, 5.0)
    h = x @ p["w1"] + p["b1"]
    h = jnp.maximum(_layernorm_ref(h, p["g1"], p["be1"]), 0.0)
    h = h @ p["w2"] + p["b2"]
    h = jnp.maximum(_layernorm_ref(h, p["g2"], p["be2"]), 0.0)
    return float(ac_max) * jnp.tanh(h @ p["w3"] + p["b3"])


if __name__ == "__main__":
    key = jax.random.PRNGKey(0)
    k_obs, k_obs2, k_params = jax.random.split(key, 3)

    # Small shapes consistent with the module: ob_dim=16, ac_dim=6.
    B, OB_DIM, AC_DIM = 8, 16, 6
    AC_MAX = 1.0

    params = make_actor_params(k_params, OB_DIM, AC_DIM)

    # --- exactness path: f32 weights + f32 elementwise, tiny batch ---
    packed_f32 = pack_actor_params(params, OB_DIM, AC_DIM, jnp.float32)
    ob = jax.random.normal(k_obs, (B, OB_DIM), dtype=jnp.float32)
    ac = jax.block_until_ready(
        actor_forward(ob, packed_f32, AC_MAX, AC_DIM, ew_dtype=jnp.float32))
    ref = actor_forward_ref(ob, params, AC_MAX)
    assert ac.shape == (B, AC_DIM)
    assert jnp.allclose(ac, ref, atol=1e-4, rtol=1e-4), "f32 mismatch (B=8)"

    # --- non-tile-aligned batch exercising the grid (padded rows), f32 path ---
    B2 = 200
    ob2 = jax.random.normal(k_obs2, (B2, OB_DIM), dtype=jnp.float32)
    ac2 = jax.block_until_ready(
        actor_forward(ob2, packed_f32, AC_MAX, AC_DIM, tile_b=64,
                      ew_dtype=jnp.float32))
    ref2 = actor_forward_ref(ob2, params, AC_MAX)
    assert ac2.shape == (B2, AC_DIM)
    assert jnp.allclose(ac2, ref2, atol=1e-4, rtol=1e-4), "f32 mismatch (B=200)"

    # --- default fast path: bf16 matmul operands everywhere, bf16 elementwise
    #     tail on v6e/v7x (f32 LN statistics), f32 accumulation ---
    w_dt, e_dt = default_dtypes()
    packed_fast = pack_actor_params(params, OB_DIM, AC_DIM, w_dt)
    ac3 = jax.block_until_ready(
        actor_forward(ob2, packed_fast, AC_MAX, AC_DIM, tile_b=64,
                      ew_dtype=e_dt))
    assert ac3.shape == (B2, AC_DIM)
    assert jnp.allclose(ac3, ref2, atol=5e-2), "bf16 fast-path mismatch (B=200)"

    # --- default tile size / default dtypes end-to-end (single big tile) ---
    ac4 = jax.block_until_ready(actor_forward(ob2, packed_fast, AC_MAX, AC_DIM))
    assert jnp.allclose(ac4, ref2, atol=5e-2), "default-path mismatch (B=200)"

    print("KERNEL_OK")
</pallas_src>

<mosaic_0001>
module attributes {stable_mosaic.version = 11 : i64} {
  func.func @actor_kernel(%arg0: i32, %arg1: memref<2x16xf32, #tpu.memory_space<vmem>>, %arg2: memref<16x384xf32, #tpu.memory_space<vmem>>, %arg3: memref<3x384xf32, #tpu.memory_space<vmem>>, %arg4: memref<384x256xf32, #tpu.memory_space<vmem>>, %arg5: memref<3x256xf32, #tpu.memory_space<vmem>>, %arg6: memref<256x128xf32, #tpu.memory_space<vmem>>, %arg7: memref<1x128xf32, #tpu.memory_space<vmem>>, %arg8: memref<8x16xf32, #tpu.memory_space<vmem>>, %arg9: memref<8x128xf32, #tpu.memory_space<vmem>>) attributes {dimension_semantics = [#tpu.dimension_semantics<parallel>], iteration_bounds = array<i64: 1>, scalar_prefetch = 0 : i64, scratch_operands = 0 : i64, tpu.core_type = #tpu.core_type<tc>, window_params = [{pipeline_mode = #tpu.pipeline_mode<synchronous>, transform_indices = @transform_0, window_bounds = array<i64: 2, 16>}, {pipeline_mode = #tpu.pipeline_mode<synchronous>, transform_indices = @transform_1, window_bounds = array<i64: 16, 384>}, {pipeline_mode = #tpu.pipeline_mode<synchronous>, transform_indices = @transform_2, window_bounds = array<i64: 3, 384>}, {pipeline_mode = #tpu.pipeline_mode<synchronous>, transform_indices = @transform_3, window_bounds = array<i64: 384, 256>}, {pipeline_mode = #tpu.pipeline_mode<synchronous>, transform_indices = @transform_4, window_bounds = array<i64: 3, 256>}, {pipeline_mode = #tpu.pipeline_mode<synchronous>, transform_indices = @transform_5, window_bounds = array<i64: 256, 128>}, {pipeline_mode = #tpu.pipeline_mode<synchronous>, transform_indices = @transform_6, window_bounds = array<i64: 1, 128>}, {transform_indices = @transform_7, window_bounds = array<i64: 8, 16>}, {transform_indices = @transform_8, window_bounds = array<i64: 8, 128>}]} {
    %c0 = arith.constant 0 : index
    %c0_0 = arith.constant 0 : index
    %0 = vector.load %arg1[%c0, %c0_0] : memref<2x16xf32, #tpu.memory_space<vmem>>, vector<2x16xf32>
    %c0_1 = arith.constant 0 : index
    %c0_2 = arith.constant 0 : index
    %1 = vector.load %arg8[%c0_1, %c0_2] : memref<8x16xf32, #tpu.memory_space<vmem>>, vector<8x16xf32>
    %2 = vector.extract_strided_slice %0 {offsets = [0, 0], sizes = [1, 16], strides = [1, 1]} : vector<2x16xf32> to vector<1x16xf32>
    %3 = vector.broadcast %2 : vector<1x16xf32> to vector<8x16xf32>
    %4 = arith.mulf %1, %3 : vector<8x16xf32>
    %5 = vector.extract_strided_slice %0 {offsets = [1, 0], sizes = [1, 16], strides = [1, 1]} : vector<2x16xf32> to vector<1x16xf32>
    %6 = vector.broadcast %5 : vector<1x16xf32> to vector<8x16xf32>
    %7 = arith.addf %4, %6 : vector<8x16xf32>
    %cst = arith.constant -5.000000e+00 : f32
    %cst_3 = arith.constant 5.000000e+00 : f32
    %8 = vector.broadcast %cst : f32 to vector<8x16xf32>
    %9 = arith.maximumf %8, %7 : vector<8x16xf32>
    %10 = vector.broadcast %cst_3 : f32 to vector<8x16xf32>
    %11 = arith.minimumf %10, %9 : vector<8x16xf32>
    %c0_4 = arith.constant 0 : index
    %c0_5 = arith.constant 0 : index
    %12 = vector.load %arg3[%c0_4, %c0_5] : memref<3x384xf32, #tpu.memory_space<vmem>>, vector<3x384xf32>
    %c0_6 = arith.constant 0 : index
    %c0_7 = arith.constant 0 : index
    %13 = vector.load %arg2[%c0_6, %c0_7] : memref<16x384xf32, #tpu.memory_space<vmem>>, vector<16x384xf32>
    %cst_8 = arith.constant dense<0.000000e+00> : vector<8x384xf32>
    %14 = tpu.matmul %11, %13, %cst_8 {dimension_numbers = #tpu.dot_dimension_numbers<[1], [0], [0], [1], [0, 0, 1, 1], [], []>} : vector<8x16xf32>, vector<16x384xf32>, vector<8x384xf32> -> vector<8x384xf32>
    %15 = vector.extract_strided_slice %12 {offsets = [0, 0], sizes = [1, 384], strides = [1, 1]} : vector<3x384xf32> to vector<1x384xf32>
    %16 = vector.broadcast %15 : vector<1x384xf32> to vector<8x384xf32>
    %17 = arith.addf %14, %16 : vector<8x384xf32>
    %18 = vector.extract_strided_slice %12 {offsets = [1, 0], sizes = [1, 384], strides = [1, 1]} : vector<3x384xf32> to vector<1x384xf32>
    %19 = vector.extract_strided_slice %12 {offsets = [2, 0], sizes = [1, 384], strides = [1, 1]} : vector<3x384xf32> to vector<1x384xf32>
    %cst_9 = arith.constant dense<0.000000e+00> : vector<8xf32>
    %20 = vector.multi_reduction <add>, %17, %cst_9 [1] : vector<8x384xf32> to vector<8xf32>
    %21 = vector.shape_cast %20 : vector<8xf32> to vector<8x1xf32>
    %22 = arith.mulf %17, %17 : vector<8x384xf32>
    %cst_10 = arith.constant dense<0.000000e+00> : vector<8xf32>
    %23 = vector.multi_reduction <add>, %22, %cst_10 [1] : vector<8x384xf32> to vector<8xf32>
    %24 = vector.shape_cast %23 : vector<8xf32> to vector<8x1xf32>
    %cst_11 = arith.constant 0.00333333341 : f32
    %25 = vector.broadcast %cst_11 : f32 to vector<8x1xf32>
    %26 = arith.mulf %21, %25 : vector<8x1xf32>
    %cst_12 = arith.constant 0.00333333341 : f32
    %27 = vector.broadcast %cst_12 : f32 to vector<8x1xf32>
    %28 = arith.mulf %24, %27 : vector<8x1xf32>
    %29 = arith.mulf %26, %26 : vector<8x1xf32>
    %30 = arith.subf %28, %29 : vector<8x1xf32>
    %cst_13 = arith.constant 0.000000e+00 : f32
    %31 = vector.broadcast %cst_13 : f32 to vector<8x1xf32>
    %32 = arith.maximumf %30, %31 : vector<8x1xf32>
    %cst_14 = arith.constant 9.99999974E-6 : f32
    %33 = vector.broadcast %cst_14 : f32 to vector<8x1xf32>
    %34 = arith.addf %32, %33 : vector<8x1xf32>
    %35 = math.rsqrt %34 : vector<8x1xf32>
    %36 = vector.broadcast %26 : vector<8x1xf32> to vector<8x384xf32>
    %37 = arith.subf %17, %36 : vector<8x384xf32>
    %38 = vector.broadcast %35 : vector<8x1xf32> to vector<8x384xf32>
    %39 = arith.mulf %37, %38 : vector<8x384xf32>
    %40 = vector.broadcast %18 : vector<1x384xf32> to vector<8x384xf32>
    %41 = arith.mulf %39, %40 : vector<8x384xf32>
    %42 = vector.broadcast %19 : vector<1x384xf32> to vector<8x384xf32>
    %43 = arith.addf %41, %42 : vector<8x384xf32>
    %cst_15 = arith.constant 0.000000e+00 : f32
    %44 = vector.broadcast %cst_15 : f32 to vector<8x384xf32>
    %45 = arith.maximumf %43, %44 : vector<8x384xf32>
    %c0_16 = arith.constant 0 : index
    %c0_17 = arith.constant 0 : index
    %46 = vector.load %arg5[%c0_16, %c0_17] : memref<3x256xf32, #tpu.memory_space<vmem>>, vector<3x256xf32>
    %c0_18 = arith.constant 0 : index
    %c0_19 = arith.constant 0 : index
    %47 = vector.load %arg4[%c0_18, %c0_19] : memref<384x256xf32, #tpu.memory_space<vmem>>, vector<384x256xf32>
    %cst_20 = arith.constant dense<0.000000e+00> : vector<8x256xf32>
    %48 = tpu.matmul %45, %47, %cst_20 {dimension_numbers = #tpu.dot_dimension_numbers<[1], [0], [0], [1], [0, 0, 1, 1], [], []>} : vector<8x384xf32>, vector<384x256xf32>, vector<8x256xf32> -> vector<8x256xf32>
    %49 = vector.extract_strided_slice %46 {offsets = [0, 0], sizes = [1, 256], strides = [1, 1]} : vector<3x256xf32> to vector<1x256xf32>
    %50 = vector.broadcast %49 : vector<1x256xf32> to vector<8x256xf32>
    %51 = arith.addf %48, %50 : vector<8x256xf32>
    %52 = vector.extract_strided_slice %46 {offsets = [1, 0], sizes = [1, 256], strides = [1, 1]} : vector<3x256xf32> to vector<1x256xf32>
    %53 = vector.extract_strided_slice %46 {offsets = [2, 0], sizes = [1, 256], strides = [1, 1]} : vector<3x256xf32> to vector<1x256xf32>
    %cst_21 = arith.constant dense<0.000000e+00> : vector<8xf32>
    %54 = vector.multi_reduction <add>, %51, %cst_21 [1] : vector<8x256xf32> to vector<8xf32>
    %55 = vector.shape_cast %54 : vector<8xf32> to vector<8x1xf32>
    %56 = arith.mulf %51, %51 : vector<8x256xf32>
    %cst_22 = arith.constant dense<0.000000e+00> : vector<8xf32>
    %57 = vector.multi_reduction <add>, %56, %cst_22 [1] : vector<8x256xf32> to vector<8xf32>
    %58 = vector.shape_cast %57 : vector<8xf32> to vector<8x1xf32>
    %cst_23 = arith.constant 5.000000e-03 : f32
    %59 = vector.broadcast %cst_23 : f32 to vector<8x1xf32>
    %60 = arith.mulf %55, %59 : vector<8x1xf32>
    %cst_24 = arith.constant 5.000000e-03 : f32
    %61 = vector.broadcast %cst_24 : f32 to vector<8x1xf32>
    %62 = arith.mulf %58, %61 : vector<8x1xf32>
    %63 = arith.mulf %60, %60 : vector<8x1xf32>
    %64 = arith.subf %62, %63 : vector<8x1xf32>
    %cst_25 = arith.constant 0.000000e+00 : f32
    %65 = vector.broadcast %cst_25 : f32 to vector<8x1xf32>
    %66 = arith.maximumf %64, %65 : vector<8x1xf32>
    %cst_26 = arith.constant 9.99999974E-6 : f32
    %67 = vector.broadcast %cst_26 : f32 to vector<8x1xf32>
    %68 = arith.addf %66, %67 : vector<8x1xf32>
    %69 = math.rsqrt %68 : vector<8x1xf32>
    %70 = vector.broadcast %60 : vector<8x1xf32> to vector<8x256xf32>
    %71 = arith.subf %51, %70 : vector<8x256xf32>
    %72 = vector.broadcast %69 : vector<8x1xf32> to vector<8x256xf32>
    %73 = arith.mulf %71, %72 : vector<8x256xf32>
    %74 = vector.broadcast %52 : vector<1x256xf32> to vector<8x256xf32>
    %75 = arith.mulf %73, %74 : vector<8x256xf32>
    %76 = vector.broadcast %53 : vector<1x256xf32> to vector<8x256xf32>
    %77 = arith.addf %75, %76 : vector<8x256xf32>
    %cst_27 = arith.constant 0.000000e+00 : f32
    %78 = vector.broadcast %cst_27 : f32 to vector<8x256xf32>
    %79 = arith.maximumf %77, %78 : vector<8x256xf32>
    %c0_28 = arith.constant 0 : index
    %c0_29 = arith.constant 0 : index
    %80 = vector.load %arg6[%c0_28, %c0_29] : memref<256x128xf32, #tpu.memory_space<vmem>>, vector<256x128xf32>
    %cst_30 = arith.constant dense<0.000000e+00> : vector<8x128xf32>
    %81 = tpu.matmul %79, %80, %cst_30 {dimension_numbers = #tpu.dot_dimension_numbers<[1], [0], [0], [1], [0, 0, 1, 1], [], []>} : vector<8x256xf32>, vector<256x128xf32>, vector<8x128xf32> -> vector<8x128xf32>
    %c0_31 = arith.constant 0 : index
    %c0_32 = arith.constant 0 : index
    %82 = vector.load %arg7[%c0_31, %c0_32] : memref<1x128xf32, #tpu.memory_space<vmem>>, vector<1x128xf32>
    %83 = vector.broadcast %82 : vector<1x128xf32> to vector<8x128xf32>
    %84 = arith.addf %81, %83 : vector<8x128xf32>
    %85 = math.tanh %84 : vector<8x128xf32>
    %cst_33 = arith.constant 1.000000e+00 : f32
    %86 = vector.broadcast %cst_33 : f32 to vector<8x128xf32>
    %87 = arith.mulf %86, %85 : vector<8x128xf32>
    %c0_34 = arith.constant 0 : index
    %c0_35 = arith.constant 0 : index
    %88 = vector.load %arg9[%c0_34, %c0_35] : memref<8x128xf32, #tpu.memory_space<vmem>>, vector<8x128xf32>
    tpu.vector_store %arg9[%c0_34, %c0_35], %87 {strides = array<i32>} : memref<8x128xf32, #tpu.memory_space<vmem>>, vector<8x128xf32>,
    return
  }
  func.func @transform_0(%arg0: i32) -> (i32, i32) {
    %c0_i32 = arith.constant 0 : i32
    %c0_i32_0 = arith.constant 0 : i32
    %c0_i32_1 = arith.constant 0 : i32
    return %c0_i32, %c0_i32_0 : i32, i32
  }
  func.func @transform_1(%arg0: i32) -> (i32, i32) {
    %c0_i32 = arith.constant 0 : i32
    %c0_i32_0 = arith.constant 0 : i32
    %c0_i32_1 = arith.constant 0 : i32
    return %c0_i32, %c0_i32_0 : i32, i32
  }
  func.func @transform_2(%arg0: i32) -> (i32, i32) {
    %c0_i32 = arith.constant 0 : i32
    %c0_i32_0 = arith.constant 0 : i32
    %c0_i32_1 = arith.constant 0 : i32
    return %c0_i32, %c0_i32_0 : i32, i32
  }
  func.func @transform_3(%arg0: i32) -> (i32, i32) {
    %c0_i32 = arith.constant 0 : i32
    %c0_i32_0 = arith.constant 0 : i32
    %c0_i32_1 = arith.constant 0 : i32
    return %c0_i32, %c0_i32_0 : i32, i32
  }
  func.func @transform_4(%arg0: i32) -> (i32, i32) {
    %c0_i32 = arith.constant 0 : i32
    %c0_i32_0 = arith.constant 0 : i32
    %c0_i32_1 = arith.constant 0 : i32
    return %c0_i32, %c0_i32_0 : i32, i32
  }
  func.func @transform_5(%arg0: i32) -> (i32, i32) {
    %c0_i32 = arith.constant 0 : i32
    %c0_i32_0 = arith.constant 0 : i32
    %c0_i32_1 = arith.constant 0 : i32
    return %c0_i32, %c0_i32_0 : i32, i32
  }
  func.func @transform_6(%arg0: i32) -> (i32, i32) {
    %c0_i32 = arith.constant 0 : i32
    %c0_i32_0 = arith.constant 0 : i32
    %c0_i32_1 = arith.constant 0 : i32
    return %c0_i32, %c0_i32_0 : i32, i32
  }
  func.func @transform_7(%arg0: i32) -> (i32, i32) {
    %c0_i32 = arith.constant 0 : i32
    %c0_i32_0 = arith.constant 0 : i32
    return %arg0, %c0_i32 : i32, i32
  }
  func.func @transform_8(%arg0: i32) -> (i32, i32) {
    %c0_i32 = arith.constant 0 : i32
    %c0_i32_0 = arith.constant 0 : i32
    return %arg0, %c0_i32 : i32, i32
  }
}

</mosaic_0001>

<bundles_post_ra>
// kernel: tpu_custom_call.1
= control target key start
LH: loop header
LB: loop body
LE: loop exit
PB: predicated region body
PF: predicated region fallthrough
CT: control target
= control target key end

     0   :  { %13 = vsyncpa [#allocation3], 0  ;;  %s1417_s0 = inlined_call_operand.hbm [shape: f32[2,16], index: 0, kind: input, shape index: {}]   ;;  %s1418_s1 = inlined_call_operand.hbm [shape: f32[16,384], index: 1, kind: input, shape index: {}]   ;;  %s1419_s2 = inlined_call_operand.hbm [shape: f32[3,384], index: 2, kind: input, shape index: {}]   ;;  %s1420_s3 = inlined_call_operand.hbm [shape: f32[384,256], index: 3, kind: input, shape index: {}]   ;;  %s1421_s4 = inlined_call_operand.vmem [shape: f32[3,256], index: 4, kind: input, shape index: {}]   ;;  %s1422_s5 = inlined_call_operand.hbm [shape: f32[256,128], index: 5, kind: input, shape index: {}]   ;;  %s1423_s6 = inlined_call_operand.vmem [shape: f32[1,128], index: 6, kind: input, shape index: {}]   ;;  %s1424_s7 = inlined_call_operand.vmem [shape: f32[8,16], index: 7, kind: input, shape index: {}]   ;;  %s1425_s8 = inlined_call_operand.hbm [shape: f32[8,128], index: 8, kind: output, shape index: {}]  }
   0x1   :  { %14 = vsyncpa [#allocation6], 0 }
   0x2   :  { %15 = vsyncpa [#allocation9], 0 }
   0x3   :  { %16 = vsyncpa [#allocation4], 0  ;;  %s1173_s27 = smov [#allocation5]   ;;  %s1033_s9 = scalar_lea.hbm %s1418_s1, 768 }
   0x4   :  { %s32_s28 = sshll.u32 %s1173_s27, 4  ;;  %p1034_p0 = scmp.ne.s32.totalorder %s1418_s1, %s1033_s9  ;;  %s33_s28 = int_to_ptr.vmem [resolvable:$true] %s32_s28 }
   0x5   :  { %p1037_p1 = scmp.lt.u32.totalorder %s1033_s9, %s1418_s1 }
   0x7   :  { %p1039_p2 = pnand %p1037_p1, %p1034_p0 }
   0x9   :  { %1042 = shalt.err (!%p1039_p2)
}
   0xa   :  { %s1043_s14 = scalar_lea.vmem %s33_s28, 768  ;;  %p1048_p4 = scmp.lt.s32.totalorder %s33_s28, %s33_s28 }
   0xb   :  { %p1044_p3 = scmp.ne.s32.totalorder %s33_s28, %s1043_s14  ;;  %p1049_p5 = scmp.lt.s32.totalorder %s1043_s14, %s1043_s14 }
   0xd   :  { %p1050_p6 = por %p1049_p5, %p1048_p4 }
   0xf   :  { %p1051_p7 = pnand %p1050_p6, %p1044_p3 }
  0x11   :  { %1054 = shalt.err (!%p1051_p7)
}
  0x12   :  { %s1174_s15 = smov 384   ;;  %s1175_s16 = smov 24  }
  0x13   :  { %38 = dma.hbm_to_vmem [thread:$0]  %s1418_s1, 768, %s33_s28, [#allocation6], %s1174_s15, %s1174_s15, %s1175_s16  }
  0x14   :  { %s1176_s19 = smov [#allocation8]   ;;  %s1055_s23 = scalar_lea.hbm %s1420_s3, 12288 }
  0x15   :  { %s54_s20 = sshll.u32 %s1176_s19, 4  ;;  %p1056_p8 = scmp.ne.s32.totalorder %s1420_s3, %s1055_s23  ;;  %s55_s20 = int_to_ptr.vmem [resolvable:$true] %s54_s20 }
  0x16   :  { %p1059_p9 = scmp.lt.u32.totalorder %s1055_s23, %s1420_s3 }
  0x18   :  { %p1061_p10 = pnand %p1059_p9, %p1056_p8 }
  0x1a   :  { %1064 = shalt.err (!%p1061_p10)
}
  0x1b   :  { %s1065_s29 = scalar_lea.vmem %s55_s20, 12288  ;;  %p1070_p12 = scmp.lt.s32.totalorder %s55_s20, %s55_s20 }
  0x1c   :  { %p1066_p11 = scmp.ne.s32.totalorder %s55_s20, %s1065_s29  ;;  %p1071_p13 = scmp.lt.s32.totalorder %s1065_s29, %s1065_s29 }
  0x1e   :  { %p1072_p0 = por %p1071_p13, %p1070_p12 }
  0x20   :  { %p1073_p1 = pnand %p1072_p0, %p1066_p11 }
  0x22   :  { %1076 = shalt.err (!%p1073_p1)
}
  0x23   :  { %s1177_s1 = smov 256   ;;  %s1178_s28 = smov 16  }
  0x24   :  { %60 = dma.hbm_to_vmem [thread:$0]  %s1420_s3, 12288, %s55_s20, [#allocation9], %s1177_s1, %s1177_s1, %s1178_s28  }
  0x25   :  { %s1179_s10 = smov [#allocation2]   ;;  %s1180_s12 = smov [#allocation7]  }
  0x26   :  { %s23_s11 = sshll.u32 %s1179_s10, 4  ;;  %s45_s13 = sshll.u32 %s1180_s12, 4  ;;  %s24_s11 = int_to_ptr.vmem [resolvable:$true] %s23_s11  ;;  %s46_s13 = int_to_ptr.vmem [resolvable:$true] %s45_s13 }
  0x27   :  { %s1077_s16 = scalar_lea.hbm %s1417_s0, 32 }
  0x28   :  { %p1078_p2 = scmp.ne.s32.totalorder %s1417_s0, %s1077_s16  ;;  %p1081_p3 = scmp.lt.u32.totalorder %s1077_s16, %s1417_s0 }
  0x2a   :  { %p1083_p4 = pnand %p1081_p3, %p1078_p2 }
  0x2c   :  { %1086 = shalt.err (!%p1083_p4)
}
  0x2d   :  { %s1087_s3 = scalar_lea.vmem %s24_s11, 32  ;;  %p1092_p6 = scmp.lt.s32.totalorder %s24_s11, %s24_s11 }
  0x2e   :  { %p1088_p5 = scmp.ne.s32.totalorder %s24_s11, %s1087_s3  ;;  %p1093_p7 = scmp.lt.s32.totalorder %s1087_s3, %s1087_s3 }
  0x30   :  { %p1094_p8 = por %p1093_p7, %p1092_p6 }
  0x32   :  { %p1095_p9 = pnand %p1094_p8, %p1088_p5 }
  0x34   :  { %1098 = shalt.err (!%p1095_p9)
}
  0x35   :  { %26 = dma.hbm_to_vmem [thread:$0]  %s1417_s0, 32, %s24_s11, [#allocation3]  }
  0x36   :  { %s1099_s25 = scalar_lea.hbm %s1419_s2, 192 }
  0x37   :  { %p1100_p10 = scmp.ne.s32.totalorder %s1419_s2, %s1099_s25  ;;  %p1103_p11 = scmp.lt.u32.totalorder %s1099_s25, %s1419_s2 }
  0x39   :  { %p1105_p12 = pnand %p1103_p11, %p1100_p10 }
  0x3b   :  { %1108 = shalt.err (!%p1105_p12)
}
  0x3c   :  { %s1109_s28 = scalar_lea.vmem %s46_s13, 192  ;;  %p1114_p0 = scmp.lt.s32.totalorder %s46_s13, %s46_s13 }
  0x3d   :  { %p1110_p13 = scmp.ne.s32.totalorder %s46_s13, %s1109_s28  ;;  %p1115_p1 = scmp.lt.s32.totalorder %s1109_s28, %s1109_s28 }
  0x3f   :  { %p1116_p2 = por %p1115_p1, %p1114_p0 }
  0x41   :  { %p1117_p3 = pnand %p1116_p2, %p1110_p13 }
  0x43   :  { %1120 = shalt.err (!%p1117_p3)
}
  0x44   :  { %48 = dma.hbm_to_vmem [thread:$0]  %s1419_s2, 192, %s46_s13, [#allocation6]  }
  0x45   :  { %s1181_s9 = smov [#allocation10]   ;;  %s1121_s14 = scalar_lea.hbm %s1422_s5, 4096 }
  0x46   :  { %s68_s10 = sshll.u32 %s1181_s9, 4  ;;  %p1122_p4 = scmp.ne.s32.totalorder %s1422_s5, %s1121_s14  ;;  %s69_s10 = int_to_ptr.vmem [resolvable:$true] %s68_s10 }
  0x47   :  { %p1125_p5 = scmp.lt.u32.totalorder %s1121_s14, %s1422_s5 }
  0x49   :  { %p1127_p6 = pnand %p1125_p5, %p1122_p4 }
  0x4b   :  { %1130 = shalt.err (!%p1127_p6)
}
  0x4c   :  { %s1131_s19 = scalar_lea.vmem %s69_s10, 4096  ;;  %p1136_p8 = scmp.lt.s32.totalorder %s69_s10, %s69_s10 }
  0x4d   :  { %p1132_p7 = scmp.ne.s32.totalorder %s69_s10, %s1131_s19  ;;  %p1137_p9 = scmp.lt.s32.totalorder %s1131_s19, %s1131_s19 }
  0x4f   :  { %p1138_p10 = por %p1137_p9, %p1136_p8 }
  0x51   :  { %p1139_p11 = pnand %p1138_p10, %p1132_p7 }
  0x53   :  { %1142 = shalt.err (!%p1139_p11)
}
  0x54   :  { %s1182_s2 = smov 128   ;;  %s1183_s13 = smov 8  }
  0x55   :  { %74 = dma.hbm_to_vmem [thread:$0]  %s1422_s5, 4096, %s69_s10, [#allocation9], %s1182_s2, %s1182_s2, %s1183_s13  }
  0x56   :  { %1165 = dma.done.wait [#allocation3], 32  }
  0x57   :  { %1166 = vsyncadd [#allocation3], 4294967264 }
  0x58   :  { %1167 = dma.done.wait [#allocation6], 960  }
  0x59   :  { %1168 = vsyncadd [#allocation6], 4294966336 }
  0x5a   :  { %1169 = dma.done.wait [#allocation9], 16384  }
  0x5b   :  { %1170 = vsyncadd [#allocation9], 4294950912  ;;  %v96_v0 = vlaneseq  ;;  %v1184_v1 = vmov 0.0|0.0   ;;  %v1185_v2 = vmov 0.0   ;;  %vm1186_vm0 = vmmov 0   ;;  %v111_v6 = vld [vmem:[#allocation5 + $0x8] sm:$0xff] }
  0x5c   :  { %877 = vmatprep.subr.bf16.mxu1 %v1184_v1  ;;  %213 = vmatprep.mubr.f32.mxu0 %v1185_v2  ;;  %v114_v7 = vld [vmem:[#allocation5 + $0x20] sm:$0xff]  ;;  %v113_v10 = vld [vmem:[#allocation5 + $0x18] sm:$0xff]  ;;  %v112_v11 = vld [vmem:[#allocation5 + $0x10] sm:$0xff]  ;;  %vm145_vm1 = vcmask 130048   ;;  %s1187_s24 = smov [#allocation11]  }
  0x5d   :  { %v1293_v3 = vshrl.u32 %v96_v0, 7  ;;  %870 = vmatprep.mubr.msk.f32.mxu1 %vm1186_vm0, %v1185_v2  ;;  %v110_v8 = vld [vmem:[#allocation5] sm:$0xff]  ;;  %v873_v9 = vpack.c.bf16 %v114_v7, %v111_v6  ;;  %v115_v12 = vld [vmem:[#allocation5 + $0x28] sm:$0xff]  ;;  %v94_v15 = vld [vmem:[#allocation2] sm:$0x3]  ;;  %s813_s25 = sshll.u32 %s1187_s24, 4  ;;  %s814_s25 = int_to_ptr.vmem [resolvable:$true] %s813_s25 }
  0x5e   :  { %v875_v13 = vpack.c.bf16 %v113_v10, %v110_v8  ;;  %v878_v14 = vpack.c.bf16 %v115_v12, %v112_v11  ;;  %v95_v16 = vld [vmem:[%s1424_s7] sm:$0xff]  ;;  %v379_v22 = vld [vmem:[#allocation8 + $0x8] sm:$0xff]  ;;  %v378_v24 = vld [vmem:[#allocation8] sm:$0xff]  ;;  %s1143_s26 = scalar_lea.vmem %s814_s25, 128  ;;  %p1148_p13 = scmp.lt.s32.totalorder %s814_s25, %s814_s25 }
  0x5f   :  { %v1296_v4 = vsub.s32 0, %v1293_v3  ;;  %v1299_v5 = vsub.s32 1, %v1293_v3  ;;  %874 = vmatprep.subr.bf16.mxu0 %v873_v9  ;;  %v381_v23 = vld [vmem:[#allocation8 + $0x18] sm:$0xff]  ;;  %v380_v26 = vld [vmem:[#allocation8 + $0x10] sm:$0xff]  ;;  %v383_v27 = vld [vmem:[#allocation8 + $0x28] sm:$0xff]  ;;  %p1144_p12 = scmp.ne.s32.totalorder %s814_s25, %s1143_s26  ;;  %p1149_p0 = scmp.lt.s32.totalorder %s1143_s26, %s1143_s26 }
  0x60   :  { %876 = vmatpush1.bf16.msra.mxu0 %v875_v13  ;;  %879 = vmatpush3.bf16.msra.mxu1 %v878_v14  ;;  %v880_v25 = vpack.c.bf16 %v381_v23, %v379_v22  ;;  %v385_v28 = vld [vmem:[#allocation8 + $0x38] sm:$0xff]  ;;  %v882_v29 = vpack.c.bf16 %v380_v26, %v378_v24  ;;  %v382_v31 = vld [vmem:[#allocation8 + $0x20] sm:$0xff]  ;;  %v384_v32 = vld [vmem:[#allocation8 + $0x30] sm:$0xff]  ;;  %v124_v13 = vsub.s32 4, %v1293_v3 }
  0x61   :  { %v99_v17 = vrot.slane %v94_v15, %v1296_v4  ;;  %v104_v18 = vrot.slane %v94_v15, %v1299_v5  ;;  %v884_v30 = vpack.c.bf16 %v385_v28, %v383_v27  ;;  %v387_v33 = vld [vmem:[#allocation8 + $0x48] sm:$0xff]  ;;  %v389_v34 = vld [vmem:[#allocation8 + $0x58] sm:$0xff]  ;;  %v886_v35 = vpack.c.bf16 %v384_v32, %v382_v31  ;;  %v386_v37 = vld [vmem:[#allocation8 + $0x40] sm:$0xff]  ;;  %p1150_p1 = por %p1149_p0, %p1148_p13 }
  0x62   :  { %881 = vmatprep.subr.bf16.mxu0 %v880_v25  ;;  %v888_v36 = vpack.c.bf16 %v389_v34, %v387_v33  ;;  %v388_v38 = vld [vmem:[#allocation8 + $0x50] sm:$0xff]  ;;  %v391_v39 = vld [vmem:[#allocation8 + $0x68] sm:$0xff]  ;;  %v393_v40 = vld [vmem:[#allocation8 + $0x78] sm:$0xff] }
  0x63   :  { %v100_v19 = vmul.f32 %v99_v17, %v95_v16  ;;  %v890_v41 = vpack.c.bf16 %v388_v38, %v386_v37  ;;  %v892_v42 = vpack.c.bf16 %v393_v40, %v391_v39  ;;  %v390_v43 = vld [vmem:[#allocation8 + $0x60] sm:$0xff]  ;;  %v392_v44 = vld [vmem:[#allocation8 + $0x70] sm:$0xff]  ;;  %v395_v45 = vld [vmem:[#allocation8 + $0x88] sm:$0xff]  ;;  %p1151_p2 = pnand %p1150_p1, %p1144_p12 }
  0x64   :  { %v397_v46 = vld [vmem:[#allocation8 + $0x98] sm:$0xff]  ;;  %v443_v47 = vld [vmem:[#allocation8 + $0x208] sm:$0xff]  ;;  %v894_v49 = vpack.c.bf16 %v392_v44, %v390_v43  ;;  %v394_v52 = vld [vmem:[#allocation8 + $0x80] sm:$0xff] }
  0x65   :  { %v105_v20 = vadd.f32 %v104_v18, %v100_v19  ;;  %v445_v48 = vld [vmem:[#allocation8 + $0x218] sm:$0xff]  ;;  %v896_v51 = vpack.c.bf16 %v397_v46, %v395_v45  ;;  %v396_v53 = vld [vmem:[#allocation8 + $0x90] sm:$0xff]  ;;  %v399_v54 = vld [vmem:[#allocation8 + $0xa8] sm:$0xff] }
  0x66   :  { %v944_v50 = vpack.c.bf16 %v445_v48, %v443_v47  ;;  %v401_v55 = vld [vmem:[#allocation8 + $0xb8] sm:$0xff]  ;;  %v898_v56 = vpack.c.bf16 %v396_v53, %v394_v52  ;;  %v398_v58 = vld [vmem:[#allocation8 + $0xa0] sm:$0xff]  ;;  %v400_v59 = vld [vmem:[#allocation8 + $0xb0] sm:$0xff] }
  0x67   :  { %v824_v21 = vclamps-f32 %v105_v20, 5.0  ;;  %v900_v57 = vpack.c.bf16 %v401_v55, %v399_v54  ;;  %v403_v60 = vld [vmem:[#allocation8 + $0xc8] sm:$0xff]  ;;  %v405_v61 = vld [vmem:[#allocation8 + $0xd8] sm:$0xff]  ;;  %v902_v62 = vpack.c.bf16 %v400_v59, %v398_v58  ;;  %v402_v0 = vld [vmem:[#allocation8 + $0xc0] sm:$0xff] }
  0x68   :  { %945 = vmatprep.subr.bf16.mxu1 %v944_v50  ;;  %v904_v63 = vpack.c.bf16 %v405_v61, %v403_v60  ;;  %v404_v1 = vld [vmem:[#allocation8 + $0xd0] sm:$0xff]  ;;  %v409_v6 = vld [vmem:[#allocation8 + $0xf8] sm:$0xff]  ;;  %v406_v9 = vld [vmem:[#allocation8 + $0xe0] sm:$0xff] }
  0x69   :  { %825 = vmatmul.mubr.msk.f32.vlgmr.msra.gmra.mrb[0].mxu0 %vm145_vm1, %v824_v21  ;;  %871 = vmatmul.mubr.msk.f32.vlgmr.msra.gmra.mrb[0].mxu1 %vm145_vm1, %v824_v21  ;;  %v906_v7 = vpack.c.bf16 %v404_v1, %v402_v0  ;;  %v408_v10 = vld [vmem:[#allocation8 + $0xf0] sm:$0xff]  ;;  %v1309_v14 = vld [vmem:[#allocation7 + $0x8] sm:$0x7]  ;;  %v442_v37 = vld [vmem:[#allocation8 + $0x200] sm:$0xff] }
  0x6a   :  { %628 = vmatprep.mubr.f32.mxu1 %v1185_v2  ;;  %883 = vmatpush1.bf16.msra.mxu0 %v882_v29  ;;  %v407_v2 = vld [vmem:[#allocation8 + $0xe8] sm:$0xff]  ;;  %v910_v11 = vpack.c.bf16 %v408_v10, %v406_v9  ;;  %v1306_v12 = vld [vmem:[#allocation7] sm:$0x77]  ;;  %v129_v17 = vrot.slane %v1309_v14, %v1296_v4  ;;  %v410_v40 = vld [vmem:[#allocation8 + $0x100] sm:$0xff] }
  0x6b   :  { %885 = vmatprep.subr.bf16.mxu0 %v884_v30  ;;  %v908_v8 = vpack.c.bf16 %v409_v6, %v407_v2  ;;  %v121_v15 = vrot.slane %v1306_v12, %v1296_v4  ;;  %v125_v16 = vrot.slane %v1306_v12, %v124_v13  ;;  %v444_v39 = vld [vmem:[#allocation8 + $0x210] sm:$0xff]  ;;  %v447_v44 = vld [vmem:[#allocation8 + $0x228] sm:$0xff]  ;;  %v449_v45 = vld [vmem:[#allocation8 + $0x238] sm:$0xff] }
  0x6c   :  { %v144_v20 = vrot.slane %v129_v17, %v1296_v4  ;;  %v948_v46 = vpack.c.bf16 %v449_v45, %v447_v44  ;;  %v415_v47 = vld [vmem:[#allocation8 + $0x128] sm:$0xff]  ;;  %v417_v48 = vld [vmem:[#allocation8 + $0x138] sm:$0xff]  ;;  %v414_v52 = vld [vmem:[#allocation8 + $0x120] sm:$0xff] }
  0x6d   :  { %v136_v18 = vrot.slane %v121_v15, %v1296_v4  ;;  %v140_v19 = vrot.slane %v125_v16, %v1296_v4  ;;  %v916_v50 = vpack.c.bf16 %v417_v48, %v415_v47  ;;  %v416_v53 = vld [vmem:[#allocation8 + $0x130] sm:$0xff]  ;;  %v419_v59 = vld [vmem:[#allocation8 + $0x148] sm:$0xff]  ;;  %v421_v60 = vld [vmem:[#allocation8 + $0x158] sm:$0xff] }
  0x6e   :  { %887 = vmatpush1.bf16.msra.mxu0 %v886_v35  ;;  %v411_v35 = vld [vmem:[#allocation8 + $0x108] sm:$0xff]  ;;  %v918_v55 = vpack.c.bf16 %v416_v53, %v414_v52  ;;  %v450_v61 = vld [vmem:[#allocation8 + $0x240] sm:$0xff]  ;;  %v420_v1 = vld [vmem:[#allocation8 + $0x150] sm:$0xff] }
  0x6f   :  { %889 = vmatprep.subr.bf16.mxu0 %v888_v36  ;;  %v413_v36 = vld [vmem:[#allocation8 + $0x118] sm:$0xff]  ;;  %v418_v0 = vld [vmem:[#allocation8 + $0x140] sm:$0xff]  ;;  %v423_v10 = vld [vmem:[#allocation8 + $0x168] sm:$0xff] }
  0x70   :  { %v912_v38 = vpack.c.bf16 %v413_v36, %v411_v35  ;;  %v922_v6 = vpack.c.bf16 %v420_v1, %v418_v0  ;;  %v454_v15 = vld [vmem:[#allocation8 + $0x260] sm:$0xff]  ;;  %v456_v17 = vld [vmem:[#allocation8 + $0x270] sm:$0xff]  ;;  %v463_v36 = vld [vmem:[#allocation8 + $0x2a8] sm:$0xff] }
  0x71   :  { %v428_v35 = vld [vmem:[#allocation8 + $0x190] sm:$0xff]  ;;  %v430_v45 = vld [vmem:[#allocation8 + $0x1a0] sm:$0xff]  ;;  %v467_v48 = vld [vmem:[#allocation8 + $0x2c8] sm:$0xff] }
  0x72   :  { %891 = vmatpush1.bf16.msra.mxu0 %v890_v41  ;;  %v412_v41 = vld [vmem:[#allocation8 + $0x110] sm:$0xff]  ;;  %v435_v52 = vld [vmem:[#allocation8 + $0x1c8] sm:$0xff]  ;;  %v437_v53 = vld [vmem:[#allocation8 + $0x1d8] sm:$0xff] }
  0x73   :  { %893 = vmatprep.subr.bf16.mxu0 %v892_v42  ;;  %v946_v42 = vpack.c.bf16 %v444_v39, %v442_v37  ;;  %v914_v43 = vpack.c.bf16 %v412_v41, %v410_v40  ;;  %v431_v39 = vld [vmem:[#allocation8 + $0x1a8] sm:$0xff]  ;;  %v433_v40 = vld [vmem:[#allocation8 + $0x1b8] sm:$0xff]  ;;  %v464_v44 = vld [vmem:[#allocation8 + $0x2b0] sm:$0xff] }
  0x74   :  { %v432_v47 = vld [vmem:[#allocation8 + $0x1b0] sm:$0xff]  ;;  %v441_v0 = vld [vmem:[#allocation8 + $0x1f8] sm:$0xff]  ;;  %v470_v1 = vld [vmem:[#allocation8 + $0x2e0] sm:$0xff] }
  0x75   :  { %947 = vmatpush1.bf16.msra.mxu1 %v946_v42  ;;  %v932_v42 = vpack.c.bf16 %v433_v40, %v431_v39 }
  0x76   :  { %895 = vmatpush1.bf16.msra.mxu0 %v894_v49  ;;  %v446_v49 = vld [vmem:[#allocation8 + $0x220] sm:$0xff]  ;;  %949 = vmatprep.subr.bf16.mxu1 %v948_v46 }
  0x77   :  { %897 = vmatprep.subr.bf16.mxu0 %v896_v51  ;;  %v448_v51 = vld [vmem:[#allocation8 + $0x230] sm:$0xff] }
  0x78   :  { %v950_v54 = vpack.c.bf16 %v448_v51, %v446_v49  ;;  %v469_v49 = vld [vmem:[#allocation8 + $0x2d8] sm:$0xff] }
  0x79   :  { %v968_v51 = vpack.c.bf16 %v469_v49, %v467_v48 }
  0x7a   :  { %899 = vmatpush1.bf16.msra.mxu0 %v898_v56  ;;  %v451_v56 = vld [vmem:[#allocation8 + $0x248] sm:$0xff]  ;;  %951 = vmatpush1.bf16.msra.mxu1 %v950_v54  ;;  %v466_v54 = vld [vmem:[#allocation8 + $0x2c0] sm:$0xff] }
  0x7b   :  { %901 = vmatprep.subr.bf16.mxu0 %v900_v57  ;;  %v453_v57 = vld [vmem:[#allocation8 + $0x258] sm:$0xff] }
  0x7c   :  { %v952_v58 = vpack.c.bf16 %v453_v57, %v451_v56  ;;  %v468_v56 = vld [vmem:[#allocation8 + $0x2d0] sm:$0xff]  ;;  %v434_v57 = vld [vmem:[#allocation8 + $0x1c0] sm:$0xff] }
  0x7e   :  { %903 = vmatpush1.bf16.msra.mxu0 %v902_v62  ;;  %v920_v62 = vpack.c.bf16 %v421_v60, %v419_v59  ;;  %953 = vmatprep.subr.bf16.mxu1 %v952_v58  ;;  %v436_v58 = vld [vmem:[#allocation8 + $0x1d0] sm:$0xff]  ;;  %v471_v59 = vld [vmem:[#allocation8 + $0x2e8] sm:$0xff]  ;;  %v473_v60 = vld [vmem:[#allocation8 + $0x2f8] sm:$0xff] }
  0x7f   :  { %905 = vmatprep.subr.bf16.mxu0 %v904_v63  ;;  %v452_v63 = vld [vmem:[#allocation8 + $0x250] sm:$0xff] }
  0x80   :  { %v954_v2 = vpack.c.bf16 %v452_v63, %v450_v61  ;;  %v439_v61 = vld [vmem:[#allocation8 + $0x1e8] sm:$0xff]  ;;  %v938_v63 = vpack.c.bf16 %v436_v58, %v434_v57 }
  0x82   :  { %907 = vmatpush1.bf16.msra.mxu0 %v906_v7  ;;  %v455_v7 = vld [vmem:[#allocation8 + $0x268] sm:$0xff]  ;;  %955 = vmatpush1.bf16.msra.mxu1 %v954_v2  ;;  %v972_v2 = vpack.c.bf16 %v473_v60, %v471_v59 }
  0x83   :  { %909 = vmatprep.subr.bf16.mxu0 %v908_v8  ;;  %v457_v8 = vld [vmem:[#allocation8 + $0x278] sm:$0xff] }
  0x84   :  { %v956_v9 = vpack.c.bf16 %v457_v8, %v455_v7  ;;  %v472_v7 = vld [vmem:[#allocation8 + $0x2f0] sm:$0xff]  ;;  %v438_v8 = vld [vmem:[#allocation8 + $0x1e0] sm:$0xff] }
  0x86   :  { %911 = vmatpush1.bf16.msra.mxu0 %v910_v11  ;;  %v425_v11 = vld [vmem:[#allocation8 + $0x178] sm:$0xff]  ;;  %957 = vmatprep.subr.bf16.mxu1 %v956_v9  ;;  %v440_v9 = vld [vmem:[#allocation8 + $0x1f0] sm:$0xff] }
  0x87   :  { %913 = vmatprep.subr.bf16.mxu0 %v912_v38  ;;  %v924_v16 = vpack.c.bf16 %v425_v11, %v423_v10  ;;  %v465_v38 = vld [vmem:[#allocation8 + $0x2b8] sm:$0xff]  ;;  %v974_v10 = vpack.c.bf16 %v472_v7, %v470_v1  ;;  %v942_v11 = vpack.c.bf16 %v440_v9, %v438_v8  ;;  %v713_v7 = vld [vmem:[#allocation10 + $0x88] sm:$0xff]  ;;  %v696_v9 = vld [vmem:[#allocation10] sm:$0xff] }
  0x88   :  { %v964_v41 = vpack.c.bf16 %v465_v38, %v463_v36 }
  0x8a   :  { %915 = vmatpush1.bf16.msra.mxu0 %v914_v43  ;;  %v462_v43 = vld [vmem:[#allocation8 + $0x2a0] sm:$0xff] }
  0x8b   :  { %917 = vmatprep.subr.bf16.mxu0 %v916_v50  ;;  %v966_v46 = vpack.c.bf16 %v464_v44, %v462_v43  ;;  %v934_v50 = vpack.c.bf16 %v432_v47, %v430_v45 }
  0x8e   :  { %919 = vmatpush1.bf16.msra.mxu0 %v918_v55  ;;  %v936_v55 = vpack.c.bf16 %v437_v53, %v435_v52  ;;  %v1367_v52 = vld [vmem:[%s1421_s4] sm:$0x77] }
  0x8f   :  { %921 = vmatprep.subr.bf16.mxu0 %v920_v62  ;;  %v970_v62 = vpack.c.bf16 %v468_v56, %v466_v54  ;;  %v478_v53 = vrot.slane %v1367_v52, %v1296_v4  ;;  %v482_v54 = vrot.slane %v1367_v52, %v124_v13 }
  0x91   :  { %v492_v56 = vrot.slane %v482_v54, %v1296_v4 }
  0x92   :  { %923 = vmatpush1.bf16.msra.mxu0 %v922_v6  ;;  %v940_v6 = vpack.c.bf16 %v441_v0, %v439_v61 }
  0x93   :  { %925 = vmatprep.subr.bf16.mxu0 %v924_v16 }
 0x13c   :  { %v215_v21 = vpop.f32.mrb[0].mxu0  ;;  %v286_v22 = vpop.f32.mrb[0].mxu1 }
 0x13d   :  { %v1321_v23 = vadd.f32 %v215_v21, %v136_v18  ;;  %v217_v24 = vpop.f32.mrb[1].mxu0  ;;  %v872_v25 = vpop.f32.mrb[1].mxu1  ;;  %v1325_v27 = vadd.f32 %v286_v22, %v144_v20  ;;  %v422_v18 = vld [vmem:[#allocation8 + $0x160] sm:$0xff]  ;;  %v958_v20 = vpack.c.bf16 %v456_v17, %v454_v15  ;;  %v459_v22 = vld [vmem:[#allocation8 + $0x288] sm:$0xff] }
 0x13e   :  { %v1323_v26 = vadd.f32 %v217_v24, %v140_v19  ;;  %v424_v19 = vld [vmem:[#allocation8 + $0x170] sm:$0xff]  ;;  %v461_v24 = vld [vmem:[#allocation8 + $0x298] sm:$0xff]  ;;  %v427_v25 = vld [vmem:[#allocation8 + $0x188] sm:$0xff] }
 0x13f   :  { %v294_v28 = vmul.f32 %v1321_v23, %v1321_v23  ;;  %v296_v32 = vmul.f32 %v1325_v27, %v1325_v27  ;;  %v926_v21 = vpack.c.bf16 %v424_v19, %v422_v18  ;;  %959 = vmatpush1.bf16.msra.mxu1 %v958_v20 }
 0x140   :  { %v295_v29 = vmul.f32 %v1323_v26, %v1323_v26  ;;  %v290_v30 = vadd.f32 %v1323_v26, %v1321_v23 }
 0x141   :  { %927 = vmatpush1.bf16.msra.mxu0 %v926_v21 }
 0x142   :  { %v291_v31 = vadd.f32 %v290_v30, %v1325_v27  ;;  %v297_v33 = vadd.f32 %v295_v29, %v294_v28  ;;  %v960_v28 = vpack.c.bf16 %v461_v24, %v459_v22  ;;  %v429_v29 = vld [vmem:[#allocation8 + $0x198] sm:$0xff]  ;;  %v458_v30 = vld [vmem:[#allocation8 + $0x280] sm:$0xff]  ;;  %v320_v24 = vsub.s32 5, %v1293_v3 }
 0x144   :  { %292 = vadd.xlane.f32.xlu0 %v291_v31  ;;  %v298_v34 = vadd.f32 %v297_v33, %v296_v32  ;;  %v460_v31 = vld [vmem:[#allocation8 + $0x290] sm:$0xff]  ;;  %v928_v32 = vpack.c.bf16 %v429_v29, %v427_v25  ;;  %961 = vmatprep.subr.bf16.mxu1 %v960_v28  ;;  %v1338_v25 = vsub.s32 2, %v1293_v3  ;;  %v350_v28 = vsub.s32 6, %v1293_v3 }
 0x145   :  { %v962_v33 = vpack.c.bf16 %v460_v31, %v458_v30  ;;  %v325_v29 = vrot.slane %v1309_v14, %v1299_v5  ;;  %v321_v30 = vrot.slane %v1306_v12, %v320_v24  ;;  %v317_v31 = vrot.slane %v1306_v12, %v1299_v5 }
 0x146   :  { %929 = vmatprep.subr.bf16.mxu0 %v928_v32  ;;  %v355_v32 = vrot.slane %v1309_v14, %v1338_v25 }
 0x147   :  { %963 = vmatpush1.bf16.msra.mxu1 %v962_v33  ;;  %v351_v33 = vrot.slane %v1306_v12, %v350_v28  ;;  %v336_v36 = vrot.slane %v321_v30, %v1299_v5  ;;  %v332_v40 = vrot.slane %v317_v31, %v1299_v5  ;;  %v700_v30 = vld [vmem:[#allocation10 + $0x20] sm:$0xff]  ;;  %v701_v31 = vld [vmem:[#allocation10 + $0x28] sm:$0xff] }
 0x148   :  { %299 = vadd.xlane.f32.xlu0 %v298_v34  ;;  %v426_v34 = vld [vmem:[#allocation8 + $0x180] sm:$0xff]  ;;  %965 = vmatprep.subr.bf16.mxu1 %v964_v41 }
 0x149   :  { %v930_v37 = vpack.c.bf16 %v428_v35, %v426_v34  ;;  %v347_v34 = vrot.slane %v1306_v12, %v1338_v25  ;;  %v340_v35 = vrot.slane %v325_v29, %v1299_v5  ;;  %v366_v41 = vrot.slane %v351_v33, %v1338_v25  ;;  %v718_v33 = vld [vmem:[#allocation10 + $0xb0] sm:$0xff] }
 0x14b   :  { %931 = vmatpush1.bf16.msra.mxu0 %v930_v37  ;;  %967 = vmatpush1.bf16.msra.mxu1 %v966_v46  ;;  %v362_v45 = vrot.slane %v347_v34, %v1338_v25  ;;  %v719_v34 = vld [vmem:[#allocation10 + $0xb8] sm:$0xff] }
 0x14c   :  { %933 = vmatprep.subr.bf16.mxu0 %v932_v42  ;;  %969 = vmatprep.subr.bf16.mxu1 %v968_v51  ;;  %v370_v42 = vrot.slane %v355_v32, %v1338_v25  ;;  %v986_v32 = vpack.c.bf16 %v701_v31, %v700_v30 }
 0x14f   :  { %935 = vmatpush1.bf16.msra.mxu0 %v934_v50  ;;  %971 = vmatpush1.bf16.msra.mxu1 %v970_v62 }
 0x150   :  { %937 = vmatprep.subr.bf16.mxu0 %v936_v55  ;;  %973 = vmatprep.subr.bf16.mxu1 %v972_v2  ;;  %v488_v55 = vrot.slane %v478_v53, %v1296_v4  ;;  %v727_v53 = vld [vmem:[#allocation10 + $0xf8] sm:$0xff] }
 0x153   :  { %939 = vmatpush1.bf16.msra.mxu0 %v938_v63  ;;  %975 = vmatpush1.bf16.msra.mxu1 %v974_v10  ;;  %v697_v10 = vld [vmem:[#allocation10 + $0x8] sm:$0xff] }
 0x154   :  { %941 = vmatprep.subr.bf16.mxu0 %v940_v6  ;;  %v712_v6 = vld [vmem:[#allocation10 + $0x80] sm:$0xff] }
 0x155   :  { %v976_v8 = vpack.c.bf16 %v713_v7, %v712_v6  ;;  %v661_v6 = vrot.slane %v1367_v52, %v320_v24  ;;  %v657_v7 = vrot.slane %v1367_v52, %v1299_v5 }
 0x157   :  { %943 = vmatpush1.bf16.msra.mxu0 %v942_v11  ;;  %v978_v11 = vpack.c.bf16 %v697_v10, %v696_v9  ;;  %977 = vmatprep.subr.bf16.mxu1 %v976_v8  ;;  %v681_v8 = vrot.slane %v1367_v52, %v350_v28  ;;  %v677_v9 = vrot.slane %v1367_v52, %v1338_v25 }
 0x159   :  { %v687_v3 = vrot.slane %v677_v9, %v1338_v25 }
 0x1d1   :  { %v293_v15 = vpop.xlane.xlu0 %292 }
 0x1d2   :  { %v301_v16 = vmul.f32 0.0033333334, %v293_v15  ;;  %v714_v15 = vld [vmem:[#allocation10 + $0x90] sm:$0xff] }
 0x1d4   :  { %v303_v18 = vmul.f32 %v301_v16, %v301_v16  ;;  %v308_v37 = vsub.f32 %v1321_v23, %v301_v16  ;;  %v309_v38 = vsub.f32 %v1323_v26, %v301_v16  ;;  %v310_v39 = vsub.f32 %v1325_v27, %v301_v16  ;;  %v715_v16 = vld [vmem:[#allocation10 + $0x98] sm:$0xff] }
 0x1d5   :  { %v300_v17 = vpop.xlane.xlu0 %299 }
 0x1d6   :  { %v302_v19 = vmul.f32 0.0033333334, %v300_v17  ;;  %v980_v17 = vpack.c.bf16 %v715_v16, %v714_v15  ;;  %v671_v15 = vrot.slane %v661_v6, %v1299_v5  ;;  %v667_v16 = vrot.slane %v657_v7, %v1299_v5  ;;  %v827_v5 = vld [vmem:[%s1423_s6] ss:$0 sm:$0xff] }
 0x1d8   :  { %v304_v20 = vsub.f32 %v302_v19, %v303_v18  ;;  %v698_v18 = vld [vmem:[#allocation10 + $0x10] sm:$0xff]  ;;  %v699_v19 = vld [vmem:[#allocation10 + $0x18] sm:$0xff] }
 0x1da   :  { %v305_v21 = vmax.f32 %v304_v20, 0.0  ;;  %v982_v20 = vpack.c.bf16 %v699_v19, %v698_v18  ;;  %v691_v18 = vrot.slane %v681_v8, %v1338_v25 }
 0x1dc   :  { %v306_v22 = vadd.f32 1e-05, %v305_v21  ;;  %v716_v21 = vld [vmem:[#allocation10 + $0xa0] sm:$0xff] }
 0x1de   :  { %1027 = vrsqrt.f32 %v306_v22  ;;  %v717_v22 = vld [vmem:[#allocation10 + $0xa8] sm:$0xff] }
 0x1df   :  { %v984_v29 = vpack.c.bf16 %v717_v22, %v716_v21 }
 0x1e8   :  { %v1028_v14 = vpop.eup %1027 }
 0x1e9   :  { %v312_v43 = vmul.f32 %v1028_v14, %v309_v38  ;;  %v313_v44 = vmul.f32 %v1028_v14, %v310_v39  ;;  %v311_v12 = vmul.f32 %v1028_v14, %v308_v37  ;;  %v703_v37 = vld [vmem:[#allocation10 + $0x38] sm:$0xff]  ;;  %v720_v39 = vld [vmem:[#allocation10 + $0xc0] sm:$0xff] }
 0x1ea   :  { %v704_v14 = vld [vmem:[#allocation10 + $0x40] sm:$0xff] }
 0x1eb   :  { %v342_v46 = vmul.f32 %v336_v36, %v312_v43  ;;  %v343_v47 = vmul.f32 %v340_v35, %v313_v44  ;;  %v341_v48 = vmul.f32 %v332_v40, %v311_v12  ;;  %v988_v35 = vpack.c.bf16 %v719_v34, %v718_v33  ;;  %v702_v36 = vld [vmem:[#allocation10 + $0x30] sm:$0xff]  ;;  %v721_v40 = vld [vmem:[#allocation10 + $0xc8] sm:$0xff]  ;;  %v723_v44 = vld [vmem:[#allocation10 + $0xd8] sm:$0xff] }
 0x1ec   :  { %v990_v38 = vpack.c.bf16 %v703_v37, %v702_v36  ;;  %v722_v43 = vld [vmem:[#allocation10 + $0xd0] sm:$0xff] }
 0x1ed   :  { %v372_v23 = vadd.f32 %v366_v41, %v342_v46  ;;  %v373_v49 = vadd.f32 %v370_v42, %v343_v47  ;;  %v371_v26 = vadd.f32 %v362_v45, %v341_v48  ;;  %v992_v41 = vpack.c.bf16 %v721_v40, %v720_v39  ;;  %v705_v42 = vld [vmem:[#allocation10 + $0x48] sm:$0xff]  ;;  %v706_v46 = vld [vmem:[#allocation10 + $0x50] sm:$0xff]  ;;  %v707_v47 = vld [vmem:[#allocation10 + $0x58] sm:$0xff] }
 0x1ee   :  { %v994_v12 = vpack.c.bf16 %v705_v42, %v704_v14  ;;  %v996_v45 = vpack.c.bf16 %v723_v44, %v722_v43  ;;  %v724_v48 = vld [vmem:[#allocation10 + $0xe0] sm:$0xff] }
 0x1ef   :  { %v375_v50 = vmax.f32 %v372_v23, 0.0  ;;  %v376_v27 = vmax.f32 %v373_v49, 0.0  ;;  %v374_v51 = vmax.f32 %v371_v26, 0.0  ;;  %v725_v23 = vld [vmem:[#allocation10 + $0xe8] sm:$0xff]  ;;  %v998_v49 = vpack.c.bf16 %v707_v47, %v706_v46 }
 0x1f0   :  { %v1000_v26 = vpack.c.bf16 %v725_v23, %v724_v48 }
 0x1f1   :  { %557 = vmatprep.mubr.f32.mxu0 %v375_v50  ;;  %629 = vmatmul.mubr.f32.vlgmr.msra.gmra.mrb[2].mxu1 %v376_v27  ;;  %v708_v50 = vld [vmem:[#allocation10 + $0x60] sm:$0xff]  ;;  %v709_v27 = vld [vmem:[#allocation10 + $0x68] sm:$0xff] }
 0x1f2   :  { %558 = vmatmul.mubr.f32.vlgmr.msra.gmra.mrb[2].mxu0 %v374_v51  ;;  %979 = vmatpush3.bf16.msra.mxu1 %v978_v11  ;;  %v726_v51 = vld [vmem:[#allocation10 + $0xf0] sm:$0xff]  ;;  %v1002_v54 = vpack.c.bf16 %v709_v27, %v708_v50 }
 0x1f3   :  { %981 = vmatprep.subr.bf16.mxu1 %v980_v17 }
 0x1f6   :  { %983 = vmatpush3.bf16.msra.mxu1 %v982_v20 }
 0x1f7   :  { %985 = vmatprep.subr.bf16.mxu1 %v984_v29 }
 0x1fa   :  { %987 = vmatpush3.bf16.msra.mxu1 %v986_v32 }
 0x1fb   :  { %989 = vmatprep.subr.bf16.mxu1 %v988_v35 }
 0x1fe   :  { %991 = vmatpush3.bf16.msra.mxu1 %v990_v38 }
 0x1ff   :  { %993 = vmatprep.subr.bf16.mxu1 %v992_v41 }
 0x202   :  { %995 = vmatpush3.bf16.msra.mxu1 %v994_v12 }
 0x203   :  { %997 = vmatprep.subr.bf16.mxu1 %v996_v45 }
 0x206   :  { %999 = vmatpush3.bf16.msra.mxu1 %v998_v49 }
 0x207   :  { %1001 = vmatprep.subr.bf16.mxu1 %v1000_v26 }
 0x20a   :  { %1003 = vmatpush3.bf16.msra.mxu1 %v1002_v54 }
 0x2c4   :  { %v630_v57 = vpop.f32.mrb[2].mxu1 }
 0x2c5   :  { %v559_v58 = vpop.f32.mrb[2].mxu0  ;;  %v632_v59 = vpop.f32.mrb[3].mxu1 }
 0x2c6   :  { %v560_v60 = vadd.f32 %v559_v58, %v488_v55  ;;  %v561_v61 = vpop.f32.mrb[3].mxu0  ;;  %v1004_v55 = vpack.c.bf16 %v727_v53, %v726_v51 }
 0x2c7   :  { %v562_v62 = vadd.f32 %v561_v61, %v492_v56  ;;  %v710_v56 = vld [vmem:[#allocation10 + $0x70] sm:$0xff] }
 0x2c8   :  { %v1376_v63 = vadd.f32 %v630_v57, %v560_v60  ;;  %v711_v57 = vld [vmem:[#allocation10 + $0x78] sm:$0xff]  ;;  %1005 = vmatprep.subr.bf16.mxu1 %v1004_v55 }
 0x2c9   :  { %v1378_v0 = vadd.f32 %v632_v59, %v562_v62  ;;  %v1006_v58 = vpack.c.bf16 %v711_v57, %v710_v56 }
 0x2ca   :  { %v638_v13 = vmul.f32 %v1376_v63, %v1376_v63 }
 0x2cb   :  { %v635_v1 = vadd.f32 %v1378_v0, %v1376_v63  ;;  %v639_v2 = vmul.f32 %v1378_v0, %v1378_v0  ;;  %1007 = vmatpush3.bf16.msra.mxu1 %v1006_v58 }
 0x2cd   :  { %636 = vadd.xlane.f32.xlu1 %v635_v1  ;;  %v640_v4 = vadd.f32 %v639_v2, %v638_v13 }
 0x2d1   :  { %641 = vadd.xlane.f32.xlu1 %v640_v4 }
 0x35a   :  { %v637_v59 = vpop.xlane.xlu1 %636 }
 0x35b   :  { %v643_v60 = vmul.f32 0.005, %v637_v59 }
 0x35d   :  { %v645_v62 = vmul.f32 %v643_v60, %v643_v60  ;;  %v650_v10 = vsub.f32 %v1376_v63, %v643_v60  ;;  %v651_v11 = vsub.f32 %v1378_v0, %v643_v60 }
 0x35e   :  { %v642_v61 = vpop.xlane.xlu1 %641 }
 0x35f   :  { %v644_v1 = vmul.f32 0.005, %v642_v61 }
 0x361   :  { %v646_v13 = vsub.f32 %v644_v1, %v645_v62 }
 0x363   :  { %v647_v2 = vmax.f32 %v646_v13, 0.0 }
 0x365   :  { %v648_v4 = vadd.f32 1e-05, %v647_v2 }
 0x367   :  { %1029 = vrsqrt.f32 %v648_v4 }
 0x371   :  { %v1030_v17 = vpop.eup %1029 }
 0x372   :  { %v653_v24 = vmul.f32 %v1030_v17, %v651_v11  ;;  %v652_v19 = vmul.f32 %v1030_v17, %v650_v10 }
 0x374   :  { %v673_v20 = vmul.f32 %v671_v15, %v653_v24  ;;  %v672_v28 = vmul.f32 %v667_v16, %v652_v19 }
 0x376   :  { %v693_v21 = vadd.f32 %v691_v18, %v673_v20  ;;  %v692_v22 = vadd.f32 %v687_v3, %v672_v28 }
 0x378   :  { %v695_v52 = vmax.f32 %v693_v21, 0.0  ;;  %v694_v29 = vmax.f32 %v692_v22, 0.0 }
 0x37a   :  { %799 = vmatprep.mubr.f32.mxu1 %v695_v52 }
 0x37b   :  { %800 = vmatmul.mubr.f32.vlgmr.msra.gmra.mrb[4].mxu1 %v694_v29 }
 0x44e   :  { %v863_v63 = vpop.f32.mrb[4].mxu1 }
 0x44f   :  { %v864_v0 = vpop.f32.mrb[5].mxu1 }
 0x450   :  { %v865_v30 = vadd.f32 %v864_v0, %v863_v63 }
 0x452   :  { %v802_v31 = vadd.f32 %v865_v30, %v827_v5 }
 0x454   :  { %1031 = vtanh.f32 %v802_v31 }
 0x45e   :  { %v1032_v25 = vpop.eup %1031 }
 0x45f   :  { %806 = vst [vmem:[#allocation11] sm:$0xff] %v1032_v25 }
 0x460   :  { %1154 = shalt.err (!%p1151_p2)
}
 0x461   :  { %s1155_s6 = scalar_lea.hbm %s1425_s8, 128 }
 0x462   :  { %p1156_p3 = scmp.ne.s32.totalorder %s1425_s8, %s1155_s6  ;;  %p1159_p4 = scmp.lt.u32.totalorder %s1155_s6, %s1425_s8 }
 0x464   :  { %p1161_p5 = pnand %p1159_p4, %p1156_p3 }
 0x466   :  { %1164 = shalt.err (!%p1161_p5)
}
 0x467   :  { %816 = dma.vmem_to_hbm [thread:$0]  %s814_s25, 128, %s1425_s8, [#allocation4]  }
 0x468   :  { %1171 = dma.done.wait [#allocation4], 128  }
 0x469   :  { %1172 = vsyncadd [#allocation4], 4294967168 }
 0x46a   :  { %820 = vsyncpa [#allocation3], 1 }
 0x46b   :  { %821 = vsyncpa [#allocation6], 1 }
 0x46c   :  { %822 = vsyncpa [#allocation9], 1 }
 0x46d   :  { %823 = vsyncpa [#allocation4], 1 }

</bundles_post_ra>
